<compile_context>
chip_gen: v7x
topology: tpu7x:2x2x1
jax: 0.10.0
libtpu: 0.0.40
codegen_flags: <defaults>
</compile_context>

<pallas_src>
import jax
import jax.numpy as jnp
from jax.experimental import pallas as pl
from jax.experimental.pallas import tpu as pltpu


def _dma_copy_kernel(x_hbm, o_hbm, sem):
    # One DMA descriptor for the whole array: HBM -> HBM, zero VMEM traffic.
    cp = pltpu.make_async_copy(x_hbm, o_hbm, sem)
    cp.start()
    cp.wait()


def _materialize_copy(x4d: jax.Array) -> jax.Array:
    """Materialize an NCHW array via a single whole-array HBM->HBM DMA."""
    nbytes = x4d.size * jnp.dtype(x4d.dtype).itemsize
    return pl.pallas_call(
        _dma_copy_kernel,
        out_shape=jax.ShapeDtypeStruct(x4d.shape, x4d.dtype),
        in_specs=[pl.BlockSpec(memory_space=pl.ANY)],
        out_specs=pl.BlockSpec(memory_space=pl.ANY),
        scratch_shapes=[pltpu.SemaphoreType.DMA],
        cost_estimate=pl.CostEstimate(
            flops=0, transcendentals=0, bytes_accessed=2 * nbytes),
    )(x4d)


class CoerceImage4D:
    """JAX/Pallas port of the PyTorch CoerceImage4D module.

    Default (materialize=False): pure shape coercion, zero bytes moved — the
    fastest correct implementation per the perf review.  materialize=True
    additionally forces a fresh buffer via a single HBM->HBM DMA kernel.
    """

    def __init__(self, img_channels: int, materialize: bool = False):
        self.img_channels = img_channels
        self.materialize = materialize

    def __call__(self, x: jax.Array) -> jax.Array:
        x_dims = len(x.shape)
        if x_dims > 4:
            raise ValueError(f"Probably invalid image dims x.shape={x.shape!r}")
        if x_dims == 4:
            assert x.shape[1] == self.img_channels, (
                f"Invalid channels x.shape={x.shape!r}"
            )
            x4d = x
        elif x_dims == 3:
            if x.shape[0] == self.img_channels:
                x4d = x[None, :, :, :]          # unsqueeze(0)
            else:
                assert self.img_channels == 1, f"Strange image x.shape={x.shape!r}"
                x4d = x[:, None, :, :]          # unsqueeze(1)
        else:
            assert x_dims == 2, "not an image?"
            assert self.img_channels == 1, f"Missing channels x.shape={x.shape!r}"
            x4d = x[None, None, :, :]           # unsqueeze(0).unsqueeze(1)

        if not self.materialize:
            # Review item #1: the op is pure shape glue; move zero bytes.
            return x4d
        # Optional materialized copy: one whole-array HBM->HBM DMA.
        return _materialize_copy(x4d)


if __name__ == "__main__":
    key = jax.random.PRNGKey(0)
    k1, k2, k3, k4, k5, k6 = jax.random.split(key, 6)

    # ---- Zero-copy default path (matches torch unsqueeze semantics) ----
    mod4 = CoerceImage4D(img_channels=4)
    mod1 = CoerceImage4D(img_channels=1)

    # Case 1: already 4D NCHW -> unchanged.
    x4 = jax.random.normal(k1, (2, 4, 16, 16), dtype=jnp.float32)
    y4 = jax.block_until_ready(mod4(x4))
    assert y4.shape == (2, 4, 16, 16)
    assert jnp.array_equal(y4, x4)

    # Case 2: 3D (C, H, W) with C == img_channels -> add batch dim.
    x3a = jax.random.normal(k2, (4, 16, 16), dtype=jnp.float32)
    y3a = jax.block_until_ready(mod4(x3a))
    assert y3a.shape == (1, 4, 16, 16)
    assert jnp.array_equal(y3a, x3a[None])

    # Case 3: 3D (N, H, W) with img_channels == 1 -> add channel dim.
    x3b = jax.random.normal(k3, (2, 16, 16), dtype=jnp.float32)
    y3b = jax.block_until_ready(mod1(x3b))
    assert y3b.shape == (2, 1, 16, 16)
    assert jnp.array_equal(y3b, x3b[:, None])

    # Case 4: 2D (H, W) with img_channels == 1 -> add batch + channel dims.
    x2 = jax.random.normal(k4, (16, 16), dtype=jnp.float32)
    y2 = jax.block_until_ready(mod1(x2))
    assert y2.shape == (1, 1, 16, 16)
    assert jnp.array_equal(y2, x2[None, None])

    # ---- Materialized path: exercises the single-DMA Pallas kernel ----
    mod4_copy = CoerceImage4D(img_channels=4, materialize=True)

    # Case 5: 4D f32 -> whole-array HBM->HBM DMA copy.
    x5 = jax.random.normal(k5, (2, 4, 16, 16), dtype=jnp.float32)
    y5 = jax.block_until_ready(mod4_copy(x5))
    assert y5.shape == (2, 4, 16, 16)
    assert jnp.array_equal(y5, x5)

    # Case 6: 3D bf16 -> coerce + DMA copy (dtype-agnostic path).
    x6 = jax.random.normal(k6, (4, 16, 16), dtype=jnp.bfloat16)
    y6 = jax.block_until_ready(mod4_copy(x6))
    assert y6.shape == (1, 4, 16, 16)
    assert y6.dtype == jnp.bfloat16
    assert jnp.array_equal(y6, x6[None])

    print("KERNEL_OK")
</pallas_src>

<mosaic_0001>
module attributes {stable_mosaic.version = 11 : i64} {
  func.func @_dma_copy_kernel(%arg0: memref<2x4x16x16xf32, #tpu.memory_space<any>>, %arg1: memref<2x4x16x16xf32, #tpu.memory_space<any>>, %arg2: memref<!tpu.dma_semaphore, #tpu.memory_space<semaphore_mem>>) attributes {dimension_semantics = [], scalar_prefetch = 0 : i64, scratch_operands = 1 : i64, tpu.core_type = #tpu.core_type<tc>} {
    tpu.enqueue_dma source(%arg0 : memref<2x4x16x16xf32, #tpu.memory_space<any>>) target(%arg1 : memref<2x4x16x16xf32, #tpu.memory_space<any>>) target_semaphore(%arg2 : memref<!tpu.dma_semaphore, #tpu.memory_space<semaphore_mem>>)
    tpu.wait_dma2 semaphore(%arg2 : memref<!tpu.dma_semaphore, #tpu.memory_space<semaphore_mem>>) src(%arg0 : memref<2x4x16x16xf32, #tpu.memory_space<any>>) dst(%arg1 : memref<2x4x16x16xf32, #tpu.memory_space<any>>)
    return
  }
}

</mosaic_0001>

<bundles_post_ra>
// kernel: tpu_custom_call.1
= control target key start
LH: loop header
LB: loop body
LE: loop exit
PB: predicated region body
PF: predicated region fallthrough
CT: control target
= control target key end

     0   :  { %s36_s6 = smov [#allocation2]   ;;  %s37_s7 = smov [#allocation3]   ;;  %s55_s0 = inlined_call_operand.hbm [shape: f32[2,4,16,16], index: 0, kind: input, shape index: {}]   ;;  %s56_s1 = inlined_call_operand.hbm [shape: f32[2,4,16,16], index: 1, kind: output, shape index: {}]  }
   0x1   :  { %s38_s8 = smov 0  }
   0x2   :  { %18 = dma.general %s55_s0, 2048, %s56_s1, %s36_s6, %s37_s7, [#allocation4], %s38_s8, 0  }
   0x3   :  { %34 = dma.done.wait [#allocation2], 2048 }
   0x4   :  { %35 = vsyncadd [#allocation2], 4294965248 }
   0x5   :  { %24 = vsyncmov [#allocation2] }
   0x8   :  { %s25_s13 = vpop.sfrf %24 }
   0x9   :  { %p30_p0 = scmp.ne.s32.totalorder %s25_s13, 0 }
   0xb   :  { %29 = shalt.err (%p30_p0)  }

</bundles_post_ra>
